<compile_context>
chip_gen: v6e
topology: v6e:2x2x1
jax: 0.10.0
libtpu: 0.0.40
codegen_flags: <defaults>
</compile_context>

<pallas_src>
import functools

import jax
import jax.numpy as jnp
from jax.experimental import pallas as pl
from jax.experimental.pallas import tpu as pltpu


def _dice_sums_kernel(x_ref, t_ref, inter_ref, denom_ref, *,
                      n, d, bn, bd, mask_rows, mask_cols):
    i = pl.program_id(0)   # batch-block index  ("parallel")
    k = pl.program_id(1)   # feature-chunk index ("arbitrary", reduction)

    @pl.when(k == 0)
    def _():
        inter_ref[...] = jnp.zeros_like(inter_ref)
        denom_ref[...] = jnp.zeros_like(denom_ref)

    x = x_ref[...].astype(jnp.float32)   # (bn, bd)
    t = t_ref[...].astype(jnp.float32)

    # Mask ragged tails (only traced when the block does not divide evenly).
    if mask_rows or mask_cols:
        mask = None
        if mask_cols:
            col = jax.lax.broadcasted_iota(jnp.int32, (bn, bd), 1)
            mask = (k * bd + col) < d
        if mask_rows:
            row = jax.lax.broadcasted_iota(jnp.int32, (bn, bd), 0)
            rmask = (i * bn + row) < n
            mask = rmask if mask is None else jnp.logical_and(mask, rmask)
        zero = jnp.float32(0.0)
        x = jnp.where(mask, x, zero)
        t = jnp.where(mask, t, zero)

    # Two fused per-sample reductions (x_sum and t_sum only ever used summed).
    inter_ref[...] += jnp.sum(x * t, axis=1, keepdims=True)   # (bn, 1)
    denom_ref[...] += jnp.sum(x + t, axis=1, keepdims=True)   # (bn, 1)


def _choose_tiles(N, D):
    """Pick (bn, bd) so bn*bd*4B ~= 1 MiB, honoring TPU tiling rules."""
    target = 256 * 1024  # elements per input block (~1 MiB of f32)

    want_bn = max(1, target // max(D, 1))
    if want_bn >= N:
        bn = N                          # block dim == full dim -> waived
    elif want_bn >= 8:
        bn = (want_bn // 8) * 8         # multiple of 8
    else:
        bn = N if N <= 8 else 8

    want_bd = max(1, target // bn)
    if D <= want_bd:
        bd = D                          # block dim == full dim -> waived
    else:
        bd = max(128, (want_bd // 128) * 128)   # lane-aligned chunk
    return bn, bd


def dice_loss(inp, target):
    assert inp.shape == target.shape
    N = inp.shape[0]
    D = 1
    for s in inp.shape[1:]:
        D *= s

    # Reshape only (no pad, no copy): row-major NCHW -> (N, D).
    x = inp.reshape(N, D)
    t = target.reshape(N, D)

    bn, bd = _choose_tiles(N, D)
    n_blocks = pl.cdiv(N, bn)
    k_blocks = pl.cdiv(D, bd)
    mask_rows = (n_blocks * bn) != N
    mask_cols = (k_blocks * bd) != D

    kernel = functools.partial(
        _dice_sums_kernel,
        n=N, d=D, bn=bn, bd=bd, mask_rows=mask_rows, mask_cols=mask_cols)

    out_rows = n_blocks * bn
    inter, denom = pl.pallas_call(
        kernel,
        out_shape=(jax.ShapeDtypeStruct((out_rows, 1), jnp.float32),
                   jax.ShapeDtypeStruct((out_rows, 1), jnp.float32)),
        grid=(n_blocks, k_blocks),
        in_specs=[pl.BlockSpec((bn, bd), lambda i, k: (i, k)),
                  pl.BlockSpec((bn, bd), lambda i, k: (i, k))],
        out_specs=(pl.BlockSpec((bn, 1), lambda i, k: (i, 0)),
                   pl.BlockSpec((bn, 1), lambda i, k: (i, 0))),
        compiler_params=pltpu.CompilerParams(
            dimension_semantics=("parallel", "arbitrary"),
        ),
    )(x, t)

    # Tiny epilogue in JAX (enables the "parallel" batch axis in the kernel).
    smooth = jnp.float32(1e-12)
    inter = inter[:N, 0]
    denom = denom[:N, 0]
    ratio = 2.0 * (inter + smooth) / (denom + smooth)
    return (jnp.float32(1.0) - jnp.sum(ratio) / jnp.float32(N)).astype(jnp.float32)


def dice_loss_ref(inp, target):
    N = target.shape[0]
    smooth = 1e-12
    x = inp.reshape(N, -1).astype(jnp.float32)
    t = target.reshape(N, -1).astype(jnp.float32)
    inter = (x * t).sum(axis=1)
    loss = 2 * (inter + smooth) / (x.sum(axis=1) + t.sum(axis=1) + smooth)
    return 1 - loss.sum() / N


if __name__ == "__main__":
    key = jax.random.PRNGKey(0)
    k1, k2 = jax.random.split(key)
    # NCHW inputs, small shapes
    x = jax.nn.sigmoid(jax.random.normal(k1, (2, 4, 16, 16), dtype=jnp.float32))
    y = (jax.random.uniform(k2, (2, 4, 16, 16)) > 0.5).astype(jnp.float32)

    out = dice_loss(x, y)
    out = jax.block_until_ready(out)

    ref = dice_loss_ref(x, y)
    assert jnp.allclose(out, ref, atol=1e-5, rtol=1e-5), (out, ref)
    print("KERNEL_OK")
</pallas_src>

<mosaic_0001>
module attributes {stable_mosaic.version = 11 : i64} {
  func.func @_dice_sums_kernel(%arg0: i32, %arg1: i32, %arg2: memref<2x1024xf32, #tpu.memory_space<vmem>>, %arg3: memref<2x1024xf32, #tpu.memory_space<vmem>>, %arg4: memref<2x1xf32, #tpu.memory_space<vmem>>, %arg5: memref<2x1xf32, #tpu.memory_space<vmem>>) attributes {dimension_semantics = [#tpu.dimension_semantics<parallel>, #tpu.dimension_semantics<arbitrary>], iteration_bounds = array<i64: 1, 1>, scalar_prefetch = 0 : i64, scratch_operands = 0 : i64, tpu.core_type = #tpu.core_type<tc>, window_params = [{transform_indices = @transform_0, window_bounds = array<i64: 2, 1024>}, {transform_indices = @transform_1, window_bounds = array<i64: 2, 1024>}, {transform_indices = @transform_2, window_bounds = array<i64: 2, 1>}, {transform_indices = @transform_3, window_bounds = array<i64: 2, 1>}]} {
    %c0_i32 = arith.constant 0 : i32
    %0 = arith.cmpi eq, %arg1, %c0_i32 : i32
    %1 = arith.extui %0 : i1 to i32
    %c0_i32_0 = arith.constant 0 : i32
    %2 = arith.cmpi ne, %1, %c0_i32_0 : i32
    scf.if %2 {
      %cst_13 = arith.constant 0.000000e+00 : f32
      %17 = vector.broadcast %cst_13 : f32 to vector<2x1xf32>
      %c0_14 = arith.constant 0 : index
      %c0_15 = arith.constant 0 : index
      %18 = vector.load %arg4[%c0_14, %c0_15] : memref<2x1xf32, #tpu.memory_space<vmem>>, vector<2x1xf32>
      tpu.vector_store %arg4[%c0_14, %c0_15], %17 {strides = array<i32>} : memref<2x1xf32, #tpu.memory_space<vmem>>, vector<2x1xf32>,
      %cst_16 = arith.constant 0.000000e+00 : f32
      %19 = vector.broadcast %cst_16 : f32 to vector<2x1xf32>
      %c0_17 = arith.constant 0 : index
      %c0_18 = arith.constant 0 : index
      %20 = vector.load %arg5[%c0_17, %c0_18] : memref<2x1xf32, #tpu.memory_space<vmem>>, vector<2x1xf32>
      tpu.vector_store %arg5[%c0_17, %c0_18], %19 {strides = array<i32>} : memref<2x1xf32, #tpu.memory_space<vmem>>, vector<2x1xf32>,
    } else {
    }
    %c0 = arith.constant 0 : index
    %c0_1 = arith.constant 0 : index
    %3 = vector.load %arg2[%c0, %c0_1] : memref<2x1024xf32, #tpu.memory_space<vmem>>, vector<2x1024xf32>
    %c0_2 = arith.constant 0 : index
    %c0_3 = arith.constant 0 : index
    %4 = vector.load %arg3[%c0_2, %c0_3] : memref<2x1024xf32, #tpu.memory_space<vmem>>, vector<2x1024xf32>
    %c0_4 = arith.constant 0 : index
    %c0_5 = arith.constant 0 : index
    %5 = vector.load %arg4[%c0_4, %c0_5] : memref<2x1xf32, #tpu.memory_space<vmem>>, vector<2x1xf32>
    %6 = arith.mulf %3, %4 : vector<2x1024xf32>
    %cst = arith.constant dense<0.000000e+00> : vector<2xf32>
    %7 = vector.multi_reduction <add>, %6, %cst [1] : vector<2x1024xf32> to vector<2xf32>
    %8 = vector.shape_cast %7 : vector<2xf32> to vector<2x1xf32>
    %9 = arith.addf %5, %8 : vector<2x1xf32>
    %c0_6 = arith.constant 0 : index
    %c0_7 = arith.constant 0 : index
    %10 = vector.load %arg4[%c0_6, %c0_7] : memref<2x1xf32, #tpu.memory_space<vmem>>, vector<2x1xf32>
    tpu.vector_store %arg4[%c0_6, %c0_7], %9 {strides = array<i32>} : memref<2x1xf32, #tpu.memory_space<vmem>>, vector<2x1xf32>,
    %c0_8 = arith.constant 0 : index
    %c0_9 = arith.constant 0 : index
    %11 = vector.load %arg5[%c0_8, %c0_9] : memref<2x1xf32, #tpu.memory_space<vmem>>, vector<2x1xf32>
    %12 = arith.addf %3, %4 : vector<2x1024xf32>
    %cst_10 = arith.constant dense<0.000000e+00> : vector<2xf32>
    %13 = vector.multi_reduction <add>, %12, %cst_10 [1] : vector<2x1024xf32> to vector<2xf32>
    %14 = vector.shape_cast %13 : vector<2xf32> to vector<2x1xf32>
    %15 = arith.addf %11, %14 : vector<2x1xf32>
    %c0_11 = arith.constant 0 : index
    %c0_12 = arith.constant 0 : index
    %16 = vector.load %arg5[%c0_11, %c0_12] : memref<2x1xf32, #tpu.memory_space<vmem>>, vector<2x1xf32>
    tpu.vector_store %arg5[%c0_11, %c0_12], %15 {strides = array<i32>} : memref<2x1xf32, #tpu.memory_space<vmem>>, vector<2x1xf32>,
    return
  }
  func.func @transform_0(%arg0: i32, %arg1: i32) -> (i32, i32) {
    %c0_i32 = arith.constant 0 : i32
    return %arg0, %arg1 : i32, i32
  }
  func.func @transform_1(%arg0: i32, %arg1: i32) -> (i32, i32) {
    %c0_i32 = arith.constant 0 : i32
    return %arg0, %arg1 : i32, i32
  }
  func.func @transform_2(%arg0: i32, %arg1: i32) -> (i32, i32) {
    %c0_i32 = arith.constant 0 : i32
    %c0_i32_0 = arith.constant 0 : i32
    return %arg0, %c0_i32 : i32, i32
  }
  func.func @transform_3(%arg0: i32, %arg1: i32) -> (i32, i32) {
    %c0_i32 = arith.constant 0 : i32
    %c0_i32_0 = arith.constant 0 : i32
    return %arg0, %c0_i32 : i32, i32
  }
}

</mosaic_0001>

<bundles_post_ra>
// kernel: tpu_custom_call.1
= control target key start
LH: loop header
LB: loop body
LE: loop exit
PB: predicated region body
PF: predicated region fallthrough
CT: control target
= control target key end

     0   :  { %9 = vsyncpa [#allocation3], 0  ;;  %s308_s0 = inlined_call_operand.hbm [shape: f32[2,1024], index: 0, kind: input, shape index: {}]   ;;  %s309_s1 = inlined_call_operand.hbm [shape: f32[2,1024], index: 1, kind: input, shape index: {}]   ;;  %s310_s2 = inlined_call_operand.vmem [shape: f32[2,1], index: 2, kind: output, shape index: {0}]   ;;  %s311_s3 = inlined_call_operand.vmem [shape: f32[2,1], index: 3, kind: output, shape index: {1}]  }
   0x1   :  { %10 = vsyncpa [#allocation5], 0  ;;  %s240_s12 = smov [#allocation2]   ;;  %s241_s14 = smov [#allocation4]  }
   0x2   :  { %s17_s13 = sshll.u32 %s240_s12, 4  ;;  %s27_s15 = sshll.u32 %s241_s14, 4  ;;  %s18_s13 = int_to_ptr.vmem [resolvable:$true] %s17_s13  ;;  %s28_s15 = int_to_ptr.vmem [resolvable:$true] %s27_s15 }
   0x3   :  { %s204_s16 = scalar_lea.vmem %s18_s13, 256  ;;  %p209_p1 = scmp.lt.s32.totalorder %s18_s13, %s18_s13 }
   0x4   :  { %p205_p0 = scmp.ne.s32.totalorder %s18_s13, %s204_s16  ;;  %p210_p2 = scmp.lt.s32.totalorder %s204_s16, %s204_s16 }
   0x6   :  { %p211_p3 = por %p210_p2, %p209_p1 }
   0x8   :  { %p212_p4 = pnand %p211_p3, %p205_p0 }
   0xa   :  { %215 = shalt.err (!%p212_p4)
}
   0xb   :  { %20 = dma.hbm_to_vmem [thread:$0]  %s308_s0, 256, %s18_s13, [#allocation3]  }
   0xc   :  { %s224_s19 = scalar_lea.vmem %s28_s15, 256  ;;  %p229_p6 = scmp.lt.s32.totalorder %s28_s15, %s28_s15 }
   0xd   :  { %p225_p5 = scmp.ne.s32.totalorder %s28_s15, %s224_s19  ;;  %p230_p7 = scmp.lt.s32.totalorder %s224_s19, %s224_s19 }
   0xf   :  { %p231_p8 = por %p230_p7, %p229_p6 }
  0x11   :  { %p232_p9 = pnand %p231_p8, %p225_p5 }
  0x13   :  { %235 = shalt.err (!%p232_p9)
}
  0x14   :  { %30 = dma.hbm_to_vmem [thread:$0]  %s309_s1, 256, %s28_s15, [#allocation5]  }
  0x15   :  { %236 = dma.done.wait [#allocation3], 256  }
  0x16   :  { %237 = vsyncadd [#allocation3], 4294967040 }
  0x17   :  { %238 = dma.done.wait [#allocation5], 256  }
  0x18   :  { %239 = vsyncadd [#allocation5], 4294967040  ;;  %v57_v0 = vlaneseq  ;;  %vm41_vm0 = vcmask 1024   ;;  %v242_v1 = vmov 1983009808   ;;  %v243_v4 = vmov 0.0  }
  0x19   :  { %v55_v2 = vunpack.c.l.s4 %v242_v1  ;;  %42 = vst.msk [vmem:[%s310_s2] sm:$0x3] %vm41_vm0, %v243_v4  ;;  %43 = vst.msk [vmem:[%s311_s3] sm:$0x3] %vm41_vm0, %v243_v4  ;;  %v44_v7 = vld [vmem:[#allocation2] sm:$0xff]  ;;  %v45_v8 = vld [vmem:[#allocation2 + $0x8] sm:$0xff] }
  0x1a   :  { %v58_v3 = vshrl.u32 %v57_v0, 7  ;;  %v46_v9 = vld [vmem:[#allocation4] sm:$0xff]  ;;  %v47_v10 = vld [vmem:[#allocation4 + $0x8] sm:$0xff]  ;;  %vm95_vm1 = vcmask 1041408  }
  0x1b   :  { %v56_v5 = vunpack.c.0.s8 %v55_v2  ;;  %v49_v11 = vmul.f32 %v46_v9, %v44_v7  ;;  %v117_v12 = vadd.f32 %v46_v9, %v44_v7  ;;  %v50_v13 = vmul.f32 %v47_v10, %v45_v8 }
  0x1c   :  { %v118_v20 = vadd.f32 %v47_v10, %v45_v8 }
  0x1d   :  { %v59_v6 = vsub.s32 %v56_v5, %v58_v3  ;;  %v53_v14 = vcombine.high %v49_v11, %v49_v11  ;;  %v121_v16 = vcombine.high %v117_v12, %v117_v12  ;;  %v70_v18 = vcombine.high %v50_v13, %v50_v13 }
  0x1e   :  { %v138_v31 = vcombine.high %v118_v20, %v118_v20 }
  0x1f   :  { %v60_v15 = vrot.slane %v49_v11, %v59_v6  ;;  %v128_v17 = vrot.slane %v117_v12, %v59_v6  ;;  %v77_v19 = vrot.slane %v50_v13, %v59_v6  ;;  %v67_v21 = vrot.slane %v53_v14, %v59_v6 }
  0x20   :  { %v135_v24 = vrot.slane %v121_v16, %v59_v6  ;;  %v145_v32 = vrot.slane %v118_v20, %v59_v6  ;;  %v84_v33 = vrot.slane %v70_v18, %v59_v6  ;;  %v152_v43 = vrot.slane %v138_v31, %v59_v6  ;;  %v48_v1 = vld [vmem:[%s310_s2] sm:$0x3] }
  0x21   :  { %v68_v22 = vcombine.high %v60_v15, %v60_v15  ;;  %v96_v23 = vsel %vm95_vm1, %v60_v15, 0.0  ;;  %v136_v25 = vcombine.high %v128_v17, %v128_v17  ;;  %v69_v26 = vcombine.high %v67_v21, %v67_v21  ;;  %v116_v4 = vld [vmem:[%s311_s3] sm:$0x3] }
  0x22   :  { %v99_v28 = vsel %vm95_vm1, %v67_v21, 0.0  ;;  %v137_v30 = vcombine.high %v135_v24, %v135_v24  ;;  %v85_v34 = vcombine.high %v77_v19, %v77_v19  ;;  %v163_v36 = vsel %vm95_vm1, %v128_v17, 0.0 }
  0x23   :  { %v97_v27 = vsel %vm95_vm1, %v68_v22, 0.0  ;;  %v101_v35 = vsel %vm95_vm1, %v69_v26, 0.0  ;;  %v164_v38 = vsel %vm95_vm1, %v136_v25, 0.0  ;;  %v166_v39 = vsel %vm95_vm1, %v135_v24, 0.0 }
  0x24   :  { %v98_v29 = vadd.f32 %v97_v27, %v96_v23  ;;  %v103_v40 = vsel %vm95_vm1, %v77_v19, 0.0  ;;  %v165_v41 = vadd.f32 %v164_v38, %v163_v36  ;;  %v153_v44 = vcombine.high %v145_v32, %v145_v32 }
  0x25   :  { %v168_v45 = vsel %vm95_vm1, %v137_v30, 0.0  ;;  %v86_v46 = vcombine.high %v84_v33, %v84_v33  ;;  %v105_v47 = vsel %vm95_vm1, %v85_v34, 0.0  ;;  %v170_v50 = vsel %vm95_vm1, %v145_v32, 0.0 }
  0x26   :  { %v100_v37 = vadd.f32 %v99_v28, %v98_v29  ;;  %v167_v48 = vadd.f32 %v166_v39, %v165_v41  ;;  %v107_v51 = vsel %vm95_vm1, %v84_v33, 0.0  ;;  %v154_v54 = vcombine.high %v152_v43, %v152_v43 }
  0x27   :  { %v172_v55 = vsel %vm95_vm1, %v153_v44, 0.0  ;;  %v109_v56 = vsel %vm95_vm1, %v86_v46, 0.0  ;;  %v174_v59 = vsel %vm95_vm1, %v152_v43, 0.0 }
  0x28   :  { %v102_v42 = vadd.f32 %v101_v35, %v100_v37  ;;  %v169_v52 = vadd.f32 %v168_v45, %v167_v48  ;;  %v176_v62 = vsel %vm95_vm1, %v154_v54, 0.0 }
  0x2a   :  { %v104_v49 = vadd.f32 %v103_v40, %v102_v42  ;;  %v171_v57 = vadd.f32 %v170_v50, %v169_v52 }
  0x2c   :  { %v106_v53 = vadd.f32 %v105_v47, %v104_v49  ;;  %v173_v60 = vadd.f32 %v172_v55, %v171_v57 }
  0x2e   :  { %v108_v58 = vadd.f32 %v107_v51, %v106_v53  ;;  %v175_v63 = vadd.f32 %v174_v59, %v173_v60 }
  0x30   :  { %v110_v61 = vadd.f32 %v109_v56, %v108_v58  ;;  %v177_v0 = vadd.f32 %v176_v62, %v175_v63 }
  0x32   :  { %111 = vadd.xlane.f32.xlu0 %v110_v61 }
  0x36   :  { %178 = vadd.xlane.f32.xlu0 %v177_v0 }
  0xbb   :  { %v112_v2 = vpop.xlane.xlu0 %111 }
  0xbc   :  { %v113_v3 = vadd.f32 %v112_v2, %v48_v1 }
  0xbe   :  { %115 = vst.msk [vmem:[%s310_s2] sm:$0x3] %vm41_vm0, %v113_v3 }
  0xbf   :  { %v179_v5 = vpop.xlane.xlu0 %178 }
  0xc0   :  { %v180_v6 = vadd.f32 %v179_v5, %v116_v4 }
  0xc2   :  { %181 = vst.msk [vmem:[%s311_s3] sm:$0x3] %vm41_vm0, %v180_v6 }
  0xc3   :  { %190 = vsyncpa [#allocation3], 1 }
  0xc4   :  { %191 = vsyncpa [#allocation5], 1 }

</bundles_post_ra>
